<compile_context>
chip_gen: v7x
topology: tpu7x:2x2x1
jax: 0.10.0
libtpu: 0.0.40
codegen_flags: <defaults>
</compile_context>

<pallas_src>
import jax
import jax.numpy as jnp
from jax.experimental import pallas as pl
from jax.experimental.pallas import tpu as pltpu

LANE = 128        # TPU lane width: class dim is padded to a multiple of this
NEG_INF = -1e30   # bias value for padded class columns (masks them out of the softmax)


def mlp_kernel(x_ref, w1_ref, b1_ref, w2_ref, b2_ref, wo_ref, bo_ref, o_ref):
    # Hidden layer 1: relu(x @ W1 + b1).  bf16 MXU inputs, f32 accumulation.
    h = jnp.dot(x_ref[...].astype(jnp.bfloat16), w1_ref[...],
                preferred_element_type=jnp.float32)
    h = jnp.maximum(h + b1_ref[...], 0.0)
    # TODO(synk): nn.Dropout is identity in eval/inference mode; training-mode masking not emitted.

    # Hidden layer 2: relu(h @ W2 + b2)
    h = jnp.dot(h.astype(jnp.bfloat16), w2_ref[...],
                preferred_element_type=jnp.float32)
    h = jnp.maximum(h + b2_ref[...], 0.0)

    # Output layer.  Padded class columns carry a -1e30 bias so exp() underflows to exactly 0
    # and they never win the max -> they drop out of the log_softmax reductions.
    logits = jnp.dot(h.astype(jnp.bfloat16), wo_ref[...],
                     preferred_element_type=jnp.float32) + bo_ref[...]

    # log_softmax along the class axis (all f32).
    m = jnp.max(logits, axis=1, keepdims=True)
    shifted = logits - m
    lse = jnp.log(jnp.sum(jnp.exp(shifted), axis=1, keepdims=True))
    o_ref[...] = (shifted - lse).astype(o_ref.dtype)


def _round_up(n, m):
    return ((n + m - 1) // m) * m


def prepare_params(w1, b1, w2, b2, wo, bo):
    """One-time parameter prep (hoisted out of the per-call path):
       - biases accepted 1-D (PyTorch nn.Linear convention) or 2-D; reshaped to (1, h)
       - class dim padded to 128 lanes (zero weight cols, -1e30 bias cols)
       - weights cast to bf16 for the MXU (accumulation stays f32 in-kernel)."""
    out_size = wo.shape[1]
    cls_pad = _round_up(out_size, LANE)

    b1 = jnp.asarray(b1, jnp.float32).reshape(1, -1)
    b2 = jnp.asarray(b2, jnp.float32).reshape(1, -1)
    bo = jnp.asarray(bo, jnp.float32).reshape(1, -1)

    wo_p = jnp.pad(wo, ((0, 0), (0, cls_pad - out_size)))
    bo_p = jnp.pad(bo, ((0, 0), (0, cls_pad - out_size)), constant_values=NEG_INF)

    return (w1.astype(jnp.bfloat16), b1,
            w2.astype(jnp.bfloat16), b2,
            wo_p.astype(jnp.bfloat16), bo_p,
            out_size)


def network_forward(x, params, *, out_dtype=jnp.float32, trim=True, tile_cap=512):
    """Forward pass.  `trim=False` returns the 128-lane padded log-prob slab (preferred on the
    hot path — avoids an extra HBM pass); `trim=True` matches the module's [batch, out] shape."""
    w1, b1, w2, b2, wo, bo, out_size = params
    batch, in_size = x.shape
    h1 = w1.shape[1]
    h2 = w2.shape[1]
    cls_pad = wo.shape[1]

    # Batch tile: multiple of 8, capped at 512 (sweepable), and sized so the grid has >= 2 steps
    # whenever batch >= 16 so both v7x TensorCores get work.  No wrapper-side batch pad: the
    # boundary block is masked by Pallas (rows are independent, garbage rows never stored).
    tile_b = min(tile_cap, max(8, _round_up(pl.cdiv(batch, 2), 8)))
    grid = (pl.cdiv(batch, tile_b),)

    resident = lambda i: (0, 0)  # weights / biases: DMA'd once, VMEM-resident across steps

    out_bytes = jnp.dtype(out_dtype).itemsize
    flops = 2 * batch * (in_size * h1 + h1 * h2 + h2 * cls_pad)
    bytes_accessed = (batch * in_size * x.dtype.itemsize          # x in
                      + batch * cls_pad * out_bytes               # padded output slab
                      + (in_size * h1 + h1 * h2 + h2 * cls_pad) * 2   # bf16 weights
                      + (h1 + h2 + cls_pad) * 4)                  # f32 biases
    cost = pl.CostEstimate(flops=flops,
                           transcendentals=batch * (cls_pad + 1),
                           bytes_accessed=bytes_accessed)

    out_padded = pl.pallas_call(
        mlp_kernel,
        out_shape=jax.ShapeDtypeStruct((batch, cls_pad), out_dtype),
        grid=grid,
        in_specs=[
            pl.BlockSpec((tile_b, in_size), lambda i: (i, 0)),  # x: streamed per batch tile
            pl.BlockSpec(w1.shape, resident),
            pl.BlockSpec(b1.shape, resident),
            pl.BlockSpec(w2.shape, resident),
            pl.BlockSpec(b2.shape, resident),
            pl.BlockSpec(wo.shape, resident),
            pl.BlockSpec(bo.shape, resident),
        ],
        out_specs=pl.BlockSpec((tile_b, cls_pad), lambda i: (i, 0)),  # lane-dense (128) store
        compiler_params=pltpu.CompilerParams(dimension_semantics=("parallel",)),
        cost_estimate=cost,
    )(x, w1, b1, w2, b2, wo, bo)

    if trim:
        # Extra XLA pass over the output stream; perf-sensitive consumers should keep the padded
        # slab (trim=False) and gather the `out_size` valid classes directly (e.g. NLL gather).
        return out_padded[:, :out_size]
    return out_padded


def reference_forward(x, w1, b1, w2, b2, wo, bo):
    h = jnp.maximum(x @ w1 + b1, 0.0)
    h = jnp.maximum(h @ w2 + b2, 0.0)
    logits = h @ wo + bo
    return jax.nn.log_softmax(logits, axis=1)


def reference_forward_bf16(x, w1, b1, w2, b2, wo, bo):
    bf, f32 = jnp.bfloat16, jnp.float32
    h = jnp.maximum(jnp.dot(x.astype(bf), w1.astype(bf), preferred_element_type=f32) + b1, 0.0)
    h = jnp.maximum(jnp.dot(h.astype(bf), w2.astype(bf), preferred_element_type=f32) + b2, 0.0)
    logits = jnp.dot(h.astype(bf), wo.astype(bf), preferred_element_type=f32) + bo
    return jax.nn.log_softmax(logits, axis=1)


if __name__ == "__main__":
    # Network(input_size=64, output_size=10, hidden_layers=[64, 32], drop_p=0.5) in eval mode.
    batch, input_size, h1, h2, output_size = 8, 64, 64, 32, 10

    key = jax.random.PRNGKey(0)
    k = jax.random.split(key, 7)
    x  = jax.random.normal(k[0], (batch, input_size), jnp.float32)
    w1 = jax.random.normal(k[1], (input_size, h1), jnp.float32) * 0.1
    b1 = jax.random.normal(k[2], (h1,), jnp.float32) * 0.1          # 1-D, PyTorch nn.Linear convention
    w2 = jax.random.normal(k[3], (h1, h2), jnp.float32) * 0.1
    b2 = jax.random.normal(k[4], (h2,), jnp.float32) * 0.1
    wo = jax.random.normal(k[5], (h2, output_size), jnp.float32) * 0.1
    bo = jax.random.normal(k[6], (output_size,), jnp.float32) * 0.1

    # One-time parameter prep (padding / bf16 casts hoisted out of the per-call path).
    params = prepare_params(w1, b1, w2, b2, wo, bo)

    # Hot path: keep the 128-lane padded output slab (no extra HBM pass in the wrapper).
    out_padded = network_forward(x, params, trim=False)
    jax.block_until_ready(out_padded)
    assert out_padded.shape == (batch, _round_up(output_size, LANE))

    # Parity check against the PyTorch-semantics references (trim only here).
    out = out_padded[:, :output_size]
    assert out.shape == (batch, output_size)
    ref_bf = reference_forward_bf16(x, w1, b1, w2, b2, wo, bo)  # same bf16-MXU arithmetic
    ref_f32 = reference_forward(x, w1, b1, w2, b2, wo, bo)      # pure f32 semantics
    # Note for consumers: bf16 MXU inputs give ~1e-2-level log-prob deviation vs pure f32.
    assert jnp.allclose(out, ref_bf, atol=1e-2, rtol=1e-2), "mismatch vs bf16 reference"
    assert jnp.allclose(out, ref_f32, atol=5e-2, rtol=5e-2), "mismatch vs f32 reference"
    print("KERNEL_OK")
</pallas_src>

<mosaic_0001>
module attributes {stable_mosaic.version = 11 : i64} {
  func.func @mlp_kernel(%arg0: i32, %arg1: memref<8x64xf32, #tpu.memory_space<vmem>>, %arg2: memref<64x64xbf16, #tpu.memory_space<vmem>>, %arg3: memref<1x64xf32, #tpu.memory_space<vmem>>, %arg4: memref<64x32xbf16, #tpu.memory_space<vmem>>, %arg5: memref<1x32xf32, #tpu.memory_space<vmem>>, %arg6: memref<32x128xbf16, #tpu.memory_space<vmem>>, %arg7: memref<1x128xf32, #tpu.memory_space<vmem>>, %arg8: memref<8x128xf32, #tpu.memory_space<vmem>>) attributes {dimension_semantics = [#tpu.dimension_semantics<parallel>], iteration_bounds = array<i64: 1>, scalar_prefetch = 0 : i64, scratch_operands = 0 : i64, tpu.core_type = #tpu.core_type<tc>, window_params = [{transform_indices = @transform_0, window_bounds = array<i64: 8, 64>}, {pipeline_mode = #tpu.pipeline_mode<synchronous>, transform_indices = @transform_1, window_bounds = array<i64: 64, 64>}, {pipeline_mode = #tpu.pipeline_mode<synchronous>, transform_indices = @transform_2, window_bounds = array<i64: 1, 64>}, {pipeline_mode = #tpu.pipeline_mode<synchronous>, transform_indices = @transform_3, window_bounds = array<i64: 64, 32>}, {pipeline_mode = #tpu.pipeline_mode<synchronous>, transform_indices = @transform_4, window_bounds = array<i64: 1, 32>}, {pipeline_mode = #tpu.pipeline_mode<synchronous>, transform_indices = @transform_5, window_bounds = array<i64: 32, 128>}, {pipeline_mode = #tpu.pipeline_mode<synchronous>, transform_indices = @transform_6, window_bounds = array<i64: 1, 128>}, {transform_indices = @transform_7, window_bounds = array<i64: 8, 128>}]} {
    %c0 = arith.constant 0 : index
    %c0_0 = arith.constant 0 : index
    %0 = vector.load %arg1[%c0, %c0_0] : memref<8x64xf32, #tpu.memory_space<vmem>>, vector<8x64xf32>
    %1 = arith.truncf %0 : vector<8x64xf32> to vector<8x64xbf16>
    %c0_1 = arith.constant 0 : index
    %c0_2 = arith.constant 0 : index
    %2 = vector.load %arg2[%c0_1, %c0_2] : memref<64x64xbf16, #tpu.memory_space<vmem>>, vector<64x64xbf16>
    %cst = arith.constant dense<0.000000e+00> : vector<8x64xf32>
    %3 = tpu.matmul %1, %2, %cst {dimension_numbers = #tpu.dot_dimension_numbers<[1], [0], [0], [1], [0, 0, 1, 1], [], []>} : vector<8x64xbf16>, vector<64x64xbf16>, vector<8x64xf32> -> vector<8x64xf32>
    %c0_3 = arith.constant 0 : index
    %c0_4 = arith.constant 0 : index
    %4 = vector.load %arg3[%c0_3, %c0_4] : memref<1x64xf32, #tpu.memory_space<vmem>>, vector<1x64xf32>
    %5 = vector.broadcast %4 : vector<1x64xf32> to vector<8x64xf32>
    %6 = arith.addf %3, %5 : vector<8x64xf32>
    %cst_5 = arith.constant 0.000000e+00 : f32
    %7 = vector.broadcast %cst_5 : f32 to vector<8x64xf32>
    %8 = arith.maximumf %6, %7 : vector<8x64xf32>
    %9 = arith.truncf %8 : vector<8x64xf32> to vector<8x64xbf16>
    %c0_6 = arith.constant 0 : index
    %c0_7 = arith.constant 0 : index
    %10 = vector.load %arg4[%c0_6, %c0_7] : memref<64x32xbf16, #tpu.memory_space<vmem>>, vector<64x32xbf16>
    %cst_8 = arith.constant dense<0.000000e+00> : vector<8x32xf32>
    %11 = tpu.matmul %9, %10, %cst_8 {dimension_numbers = #tpu.dot_dimension_numbers<[1], [0], [0], [1], [0, 0, 1, 1], [], []>} : vector<8x64xbf16>, vector<64x32xbf16>, vector<8x32xf32> -> vector<8x32xf32>
    %c0_9 = arith.constant 0 : index
    %c0_10 = arith.constant 0 : index
    %12 = vector.load %arg5[%c0_9, %c0_10] : memref<1x32xf32, #tpu.memory_space<vmem>>, vector<1x32xf32>
    %13 = vector.broadcast %12 : vector<1x32xf32> to vector<8x32xf32>
    %14 = arith.addf %11, %13 : vector<8x32xf32>
    %cst_11 = arith.constant 0.000000e+00 : f32
    %15 = vector.broadcast %cst_11 : f32 to vector<8x32xf32>
    %16 = arith.maximumf %14, %15 : vector<8x32xf32>
    %17 = arith.truncf %16 : vector<8x32xf32> to vector<8x32xbf16>
    %c0_12 = arith.constant 0 : index
    %c0_13 = arith.constant 0 : index
    %18 = vector.load %arg6[%c0_12, %c0_13] : memref<32x128xbf16, #tpu.memory_space<vmem>>, vector<32x128xbf16>
    %cst_14 = arith.constant dense<0.000000e+00> : vector<8x128xf32>
    %19 = tpu.matmul %17, %18, %cst_14 {dimension_numbers = #tpu.dot_dimension_numbers<[1], [0], [0], [1], [0, 0, 1, 1], [], []>} : vector<8x32xbf16>, vector<32x128xbf16>, vector<8x128xf32> -> vector<8x128xf32>
    %c0_15 = arith.constant 0 : index
    %c0_16 = arith.constant 0 : index
    %20 = vector.load %arg7[%c0_15, %c0_16] : memref<1x128xf32, #tpu.memory_space<vmem>>, vector<1x128xf32>
    %21 = vector.broadcast %20 : vector<1x128xf32> to vector<8x128xf32>
    %22 = arith.addf %19, %21 : vector<8x128xf32>
    %cst_17 = arith.constant dense<0xFF800000> : vector<8xf32>
    %23 = vector.multi_reduction <maximumf>, %22, %cst_17 [1] : vector<8x128xf32> to vector<8xf32>
    %24 = vector.shape_cast %23 : vector<8xf32> to vector<8x1xf32>
    %25 = vector.broadcast %24 : vector<8x1xf32> to vector<8x128xf32>
    %26 = arith.subf %22, %25 : vector<8x128xf32>
    %27 = math.exp %26 : vector<8x128xf32>
    %cst_18 = arith.constant dense<0.000000e+00> : vector<8xf32>
    %28 = vector.multi_reduction <add>, %27, %cst_18 [1] : vector<8x128xf32> to vector<8xf32>
    %29 = vector.shape_cast %28 : vector<8xf32> to vector<8x1xf32>
    %30 = math.log %29 : vector<8x1xf32>
    %31 = vector.broadcast %30 : vector<8x1xf32> to vector<8x128xf32>
    %32 = arith.subf %26, %31 : vector<8x128xf32>
    %c0_19 = arith.constant 0 : index
    %c0_20 = arith.constant 0 : index
    %33 = vector.load %arg8[%c0_19, %c0_20] : memref<8x128xf32, #tpu.memory_space<vmem>>, vector<8x128xf32>
    tpu.vector_store %arg8[%c0_19, %c0_20], %32 {strides = array<i32>} : memref<8x128xf32, #tpu.memory_space<vmem>>, vector<8x128xf32>,
    return
  }
  func.func @transform_0(%arg0: i32) -> (i32, i32) {
    %c0_i32 = arith.constant 0 : i32
    %c0_i32_0 = arith.constant 0 : i32
    return %arg0, %c0_i32 : i32, i32
  }
  func.func @transform_1(%arg0: i32) -> (i32, i32) {
    %c0_i32 = arith.constant 0 : i32
    %c0_i32_0 = arith.constant 0 : i32
    %c0_i32_1 = arith.constant 0 : i32
    return %c0_i32, %c0_i32_0 : i32, i32
  }
  func.func @transform_2(%arg0: i32) -> (i32, i32) {
    %c0_i32 = arith.constant 0 : i32
    %c0_i32_0 = arith.constant 0 : i32
    %c0_i32_1 = arith.constant 0 : i32
    return %c0_i32, %c0_i32_0 : i32, i32
  }
  func.func @transform_3(%arg0: i32) -> (i32, i32) {
    %c0_i32 = arith.constant 0 : i32
    %c0_i32_0 = arith.constant 0 : i32
    %c0_i32_1 = arith.constant 0 : i32
    return %c0_i32, %c0_i32_0 : i32, i32
  }
  func.func @transform_4(%arg0: i32) -> (i32, i32) {
    %c0_i32 = arith.constant 0 : i32
    %c0_i32_0 = arith.constant 0 : i32
    %c0_i32_1 = arith.constant 0 : i32
    return %c0_i32, %c0_i32_0 : i32, i32
  }
  func.func @transform_5(%arg0: i32) -> (i32, i32) {
    %c0_i32 = arith.constant 0 : i32
    %c0_i32_0 = arith.constant 0 : i32
    %c0_i32_1 = arith.constant 0 : i32
    return %c0_i32, %c0_i32_0 : i32, i32
  }
  func.func @transform_6(%arg0: i32) -> (i32, i32) {
    %c0_i32 = arith.constant 0 : i32
    %c0_i32_0 = arith.constant 0 : i32
    %c0_i32_1 = arith.constant 0 : i32
    return %c0_i32, %c0_i32_0 : i32, i32
  }
  func.func @transform_7(%arg0: i32) -> (i32, i32) {
    %c0_i32 = arith.constant 0 : i32
    %c0_i32_0 = arith.constant 0 : i32
    return %arg0, %c0_i32 : i32, i32
  }
}

</mosaic_0001>

<bundles_post_ra>
// kernel: tpu_custom_call.1
= control target key start
LH: loop header
LB: loop body
LE: loop exit
PB: predicated region body
PF: predicated region fallthrough
CT: control target
= control target key end

     0   :  { %12 = vsyncpa [#allocation3], 0  ;;  %s543_s0 = inlined_call_operand.hbm [shape: f32[8,64], index: 0, kind: input, shape index: {}]   ;;  %s544_s1 = inlined_call_operand.vmem [shape: bf16[64,64], index: 1, kind: input, shape index: {}]   ;;  %s545_s2 = inlined_call_operand.vmem [shape: f32[1,64], index: 2, kind: input, shape index: {}]   ;;  %s546_s3 = inlined_call_operand.vmem [shape: bf16[64,32], index: 3, kind: input, shape index: {}]   ;;  %s547_s4 = inlined_call_operand.vmem [shape: f32[1,32], index: 4, kind: input, shape index: {}]   ;;  %s548_s5 = inlined_call_operand.vmem [shape: bf16[32,128], index: 5, kind: input, shape index: {}]   ;;  %s549_s6 = inlined_call_operand.vmem [shape: f32[1,128], index: 6, kind: input, shape index: {}]   ;;  %s550_s7 = inlined_call_operand.hbm [shape: f32[8,128], index: 7, kind: output, shape index: {}]  }
   0x1   :  { %13 = vsyncpa [#allocation4], 0  ;;  %s431_s24 = smov [#allocation2]   ;;  %s383_s28 = scalar_lea.hbm %s543_s0, 128 }
   0x2   :  { %s20_s25 = sshll.u32 %s431_s24, 4  ;;  %p384_p0 = scmp.ne.s32.totalorder %s543_s0, %s383_s28  ;;  %s21_s25 = int_to_ptr.vmem [resolvable:$true] %s20_s25 }
   0x3   :  { %p387_p1 = scmp.lt.u32.totalorder %s383_s28, %s543_s0 }
   0x5   :  { %p389_p2 = pnand %p387_p1, %p384_p0 }
   0x7   :  { %392 = shalt.err (!%p389_p2)
}
   0x8   :  { %s393_s10 = scalar_lea.vmem %s21_s25, 128  ;;  %p398_p4 = scmp.lt.s32.totalorder %s21_s25, %s21_s25 }
   0x9   :  { %p394_p3 = scmp.ne.s32.totalorder %s21_s25, %s393_s10  ;;  %p399_p5 = scmp.lt.s32.totalorder %s393_s10, %s393_s10 }
   0xb   :  { %p400_p6 = por %p399_p5, %p398_p4 }
   0xd   :  { %p401_p7 = pnand %p400_p6, %p394_p3 }
   0xf   :  { %404 = shalt.err (!%p401_p7)
}
  0x10   :  { %23 = dma.hbm_to_vmem [thread:$0]  %s543_s0, 128, %s21_s25, [#allocation3]  }
  0x11   :  { %427 = dma.done.wait [#allocation3], 128  }
  0x12   :  { %428 = vsyncadd [#allocation3], 4294967168  ;;  %v432_v0 = vmov 0.0   ;;  %vm433_vm0 = vmmov 0   ;;  %v369_v1 = vld [vmem:[%s544_s1] sm:$0xff]   ;;  %v370_v2 = vld [vmem:[%s544_s1 + $0x8] sm:$0xff]  }
  0x13   :  { %333 = vmatprep.subr.bf16.mxu0 %v432_v0  ;;  %341 = vmatprep.mubr.msk.bf16.mxu0 %vm433_vm0, %v432_v0  ;;  %v373_v3 = vld [vmem:[%s546_s3] sm:$0xff]   ;;  %v371_v4 = vld [vmem:[%s544_s1 + $0x10] sm:$0xff]   ;;  %v374_v5 = vld [vmem:[%s546_s3 + $0x8] sm:$0xff]   ;;  %vm81_vm1 = vcmask 523264   ;;  %vm234_vm2 = vcmask 261120  }
  0x14   :  { %345 = vmatprep.subr.bf16.mxu1 %v432_v0  ;;  %353 = vmatprep.mubr.msk.bf16.mxu1 %vm433_vm0, %v432_v0  ;;  %v372_v6 = vld [vmem:[%s544_s1 + $0x18] sm:$0xff]   ;;  %v40_v7 = vld [vmem:[#allocation2] sm:$0xff]  ;;  %v375_v9 = vld [vmem:[%s546_s3 + $0x10] sm:$0xff]  }
  0x15   :  { %334 = vmatpush3.bf16.msra.mxu0 %v369_v1  ;;  %346 = vmatpush3.bf16.msra.mxu1 %v373_v3  ;;  %v41_v8 = vpack.c.bf16 %v40_v7, %v40_v7  ;;  %v376_v10 = vld [vmem:[%s546_s3 + $0x18] sm:$0xff]   ;;  %v377_v11 = vld [vmem:[%s548_s5] sm:$0xff]   ;;  %v378_v20 = vld [vmem:[%s548_s5 + $0x8] sm:$0xff]  }
  0x16   :  { %335 = vmatprep.subr.bf16.mxu0 %v432_v0  ;;  %347 = vmatprep.subr.bf16.mxu1 %v432_v0  ;;  %v304_v12 = vld [vmem:[%s545_s2] ss:$0 sm:$0xff] }
  0x17   :  { %v310_v21 = vld [vmem:[%s547_s4] ss:$0 sm:$0xff]  ;;  %s434_s4 = smov [#allocation5]  }
  0x18   :  { %v316_v29 = vld [vmem:[%s549_s6] ss:$0 sm:$0xff]  ;;  %s295_s5 = sshll.u32 %s434_s4, 4  ;;  %s296_s5 = int_to_ptr.vmem [resolvable:$true] %s295_s5 }
  0x19   :  { %336 = vmatpush3.bf16.msra.mxu0 %v370_v2  ;;  %348 = vmatpush3.bf16.msra.mxu1 %v374_v5  ;;  %s405_s6 = scalar_lea.vmem %s296_s5, 128  ;;  %p410_p9 = scmp.lt.s32.totalorder %s296_s5, %s296_s5 }
  0x1a   :  { %337 = vmatprep.subr.bf16.mxu0 %v432_v0  ;;  %349 = vmatprep.subr.bf16.mxu1 %v432_v0  ;;  %p406_p8 = scmp.ne.s32.totalorder %s296_s5, %s405_s6  ;;  %p411_p10 = scmp.lt.s32.totalorder %s405_s6, %s405_s6 }
  0x1c   :  { %p412_p11 = por %p411_p10, %p410_p9 }
  0x1d   :  { %338 = vmatpush3.bf16.msra.mxu0 %v371_v4  ;;  %350 = vmatpush3.bf16.msra.mxu1 %v375_v9 }
  0x1e   :  { %339 = vmatprep.subr.bf16.mxu0 %v432_v0  ;;  %351 = vmatprep.subr.bf16.mxu1 %v432_v0  ;;  %p413_p12 = pnand %p412_p11, %p406_p8 }
  0x21   :  { %340 = vmatpush3.bf16.msra.mxu0 %v372_v6  ;;  %352 = vmatpush3.bf16.msra.mxu1 %v376_v10 }
  0x22   :  { %357 = vmatprep.subr.bf16.mxu0 %v432_v0 }
  0x24   :  { %342 = vmatmul.mubr.msk.bf16.vlgmr.msra.gmra.mrb[0].mxu0 %vm81_vm1, %v41_v8 }
  0x25   :  { %361 = vmatprep.mubr.msk.bf16.mxu0 %vm433_vm0, %v432_v0  ;;  %358 = vmatpush3.bf16.msra.mxu0 %v377_v11 }
  0x26   :  { %359 = vmatprep.subr.bf16.mxu0 %v432_v0 }
  0x29   :  { %360 = vmatpush3.bf16.msra.mxu0 %v378_v20 }
  0xf7   :  { %v119_v13 = vpop.f32.mrb[0].mxu0 }
  0xf8   :  { %v120_v14 = vadd.f32 %v304_v12, %v119_v13  ;;  %v343_v15 = vpop.f32.mrb[1].mxu0 }
  0xf9   :  { %v122_v16 = vpop.f32.mrb[2].mxu0 }
  0xfa   :  { %v125_v17 = vmax.f32 %v120_v14, 0.0  ;;  %v344_v18 = vpop.f32.mrb[3].mxu0 }
  0xfc   :  { %v126_v19 = vpack.c.bf16 %v125_v17, %v125_v17 }
  0xfe   :  { %354 = vmatmul.mubr.msk.bf16.vlgmr.msra.gmra.mrb[0].mxu1 %vm81_vm1, %v126_v19 }
 0x1d1   :  { %v203_v22 = vpop.f32.mrb[0].mxu1 }
 0x1d2   :  { %v204_v23 = vadd.f32 %v310_v21, %v203_v22  ;;  %v355_v24 = vpop.f32.mrb[1].mxu1 }
 0x1d3   :  { %v206_v25 = vpop.f32.mrb[2].mxu1 }
 0x1d4   :  { %v209_v26 = vmax.f32 %v204_v23, 0.0  ;;  %v356_v27 = vpop.f32.mrb[3].mxu1 }
 0x1d6   :  { %v210_v28 = vpack.c.bf16 %v209_v26, %v209_v26 }
 0x1d8   :  { %362 = vmatmul.mubr.msk.bf16.vlgmr.msra.gmra.mrb[4].mxu0 %vm234_vm2, %v210_v28 }
 0x2ab   :  { %v272_v30 = vpop.f32.mrb[4].mxu0 }
 0x2ac   :  { %v273_v31 = vadd.f32 %v316_v29, %v272_v30  ;;  %v363_v32 = vpop.f32.mrb[5].mxu0 }
 0x2ad   :  { %v275_v33 = vpop.f32.mrb[6].mxu0 }
 0x2ae   :  { %278 = vmax.xlane.f32.xlu0 %v273_v31  ;;  %v364_v34 = vpop.f32.mrb[7].mxu0 }
 0x33b   :  { %v279_v35 = vpop.xlane.xlu0 %278 }
 0x33c   :  { %v280_v36 = vsub.f32 %v273_v31, %v279_v35 }
 0x33e   :  { %v281_v37 = vmul.f32 1.442695, %v280_v36 }
 0x340   :  { %379 = vpow2.f32 %v281_v37 }
 0x34a   :  { %v380_v38 = vpop.eup %379 }
 0x34b   :  { %283 = vadd.xlane.f32.xlu0 %v380_v38 }
 0x3d8   :  { %v284_v39 = vpop.xlane.xlu0 %283 }
 0x3d9   :  { %381 = vlog2.f32 %v284_v39 }
 0x3e3   :  { %v382_v40 = vpop.eup %381 }
 0x3e4   :  { %v286_v41 = vmul.f32 0.6931472, %v382_v40 }
 0x3e6   :  { %v287_v42 = vsub.f32 %v280_v36, %v286_v41 }
 0x3e8   :  { %288 = vst [vmem:[#allocation5] sm:$0xff] %v287_v42 }
 0x3e9   :  { %416 = shalt.err (!%p413_p12)
}
 0x3ea   :  { %s417_s14 = scalar_lea.hbm %s550_s7, 128 }
 0x3eb   :  { %p418_p13 = scmp.ne.s32.totalorder %s550_s7, %s417_s14  ;;  %p421_p0 = scmp.lt.u32.totalorder %s417_s14, %s550_s7 }
 0x3ed   :  { %p423_p1 = pnand %p421_p0, %p418_p13 }
 0x3ef   :  { %426 = shalt.err (!%p423_p1)
}
 0x3f0   :  { %298 = dma.vmem_to_hbm [thread:$0]  %s296_s5, 128, %s550_s7, [#allocation4]  }
 0x3f1   :  { %429 = dma.done.wait [#allocation4], 128  }
 0x3f2   :  { %430 = vsyncadd [#allocation4], 4294967168 }
 0x3f3   :  { %302 = vsyncpa [#allocation3], 1 }
 0x3f4   :  { %303 = vsyncpa [#allocation4], 1 }

</bundles_post_ra>
